<compile_context>
chip_gen: v6e
topology: v6e:2x2x1
jax: 0.10.0
libtpu: 0.0.40
codegen_flags: <defaults>
</compile_context>

<pallas_src>
import functools

import jax
import jax.numpy as jnp
from jax.experimental import pallas as pl
from jax.experimental.pallas import tpu as pltpu


_LANE = 128
_SUBLANE = 8
_VMEM_SPEC = pl.BlockSpec(memory_space=pltpu.MemorySpace.VMEM)


def _round_up(v, m):
    return ((v + m - 1) // m) * m


# ----------------------------- fused Pallas kernel --------------------------

def _make_fused_kernel(layer_kinds):
    """Build a single kernel that runs the whole GSequential stack in VMEM.

    layer_kinds: tuple of "gcn" | "relu" | "linear" (static, baked in at trace time).
    Kernel ref order: (a_norm, x, *flat_params..., out).
    """
    layer_kinds = tuple(layer_kinds)

    def kernel(*refs):
        a_ref, x_ref = refs[0], refs[1]
        o_ref = refs[-1]
        param_refs = refs[2:-1]

        a = a_ref[...]
        h = x_ref[...]
        p = 0
        for kind in layer_kinds:
            if kind == "gcn":
                w = param_refs[p][...]
                b = param_refs[p + 1][...]
                p += 2
                f_in, f_out = w.shape
                # N^2-sized matmul should use the smaller feature dim.
                if f_out < f_in:
                    h = jnp.dot(
                        a,
                        jnp.dot(h, w, preferred_element_type=jnp.float32),
                        preferred_element_type=jnp.float32,
                    ) + b
                else:
                    h = jnp.dot(
                        jnp.dot(a, h, preferred_element_type=jnp.float32),
                        w,
                        preferred_element_type=jnp.float32,
                    ) + b
            elif kind == "linear":
                w = param_refs[p][...]
                b = param_refs[p + 1][...]
                p += 2
                h = jnp.dot(h, w, preferred_element_type=jnp.float32) + b
            elif kind == "relu":
                # Fused epilogue ReLU: VPU max, no extra launch / HBM traffic.
                h = jnp.maximum(h, 0.0)
            else:
                raise NotImplementedError(kind)
        o_ref[...] = h.astype(o_ref.dtype)

    return kernel


def _fused_forward(layers, graph_conv_class, x, a_norm):
    """Run the whole layer stack in one pallas_call (everything stays in VMEM)."""
    n, f_in = x.shape

    kinds = []
    flat_params = []  # list of (w, b) or None, in layer order
    feat = f_in
    for layer in layers:
        if graph_conv_class is not None and isinstance(layer, graph_conv_class):
            kinds.append("gcn")
            flat_params.append((layer.w, layer.b))
            feat = layer.w.shape[1]
        elif isinstance(layer, Linear):
            kinds.append("linear")
            flat_params.append((layer.w, layer.b))
            feat = layer.w.shape[1]
        elif isinstance(layer, ReLU):
            kinds.append("relu")
            flat_params.append(None)
        else:
            raise NotImplementedError(f"Unsupported layer type: {type(layer)}")

    f_final = feat

    # Lane-dense output: pad the final feature dim to a multiple of 128 by zero-padding
    # the last parametric layer's W/b (safe when only zero-preserving ReLU follows it).
    param_idxs = [i for i, k in enumerate(kinds) if k in ("gcn", "linear")]
    pad_ok = bool(param_idxs) and all(
        k == "relu" for k in kinds[param_idxs[-1] + 1:]
    )
    f_pad = _round_up(f_final, _LANE) if (pad_ok and f_final % _LANE != 0) else f_final

    # Sublane-dense rows.
    n_pad = _round_up(n, _SUBLANE)

    x_p = x.astype(jnp.float32)
    a_p = a_norm.astype(jnp.float32)
    if n_pad != n:
        x_p = jnp.pad(x_p, ((0, n_pad - n), (0, 0)))
        a_p = jnp.pad(a_p, ((0, n_pad - n), (0, n_pad - n)))

    operands = [a_p, x_p]
    for i, pr in zip(range(len(kinds)), flat_params):
        if pr is None:
            continue
        w, b = pr
        w = w.astype(jnp.float32)
        b = b.astype(jnp.float32)
        if pad_ok and i == param_idxs[-1] and f_pad != f_final:
            w = jnp.pad(w, ((0, 0), (0, f_pad - f_final)))
            b = jnp.pad(b, ((0, f_pad - f_final),))
        operands.append(w)
        operands.append(b.reshape(1, -1))

    out = pl.pallas_call(
        _make_fused_kernel(tuple(kinds)),
        out_shape=jax.ShapeDtypeStruct((n_pad, f_pad), jnp.float32),
        in_specs=[_VMEM_SPEC] * len(operands),
        out_specs=_VMEM_SPEC,
    )(*operands)

    return out[:n, :f_final]


# ----------------------------- layer wrappers --------------------------------

class GCNConv:
    """Dense GCN convolution: D^-1/2 (A+I) D^-1/2 X W + b (runs inside fused kernel)."""

    def __init__(self, w, b):
        self.w = w
        self.b = b


class Linear:
    def __init__(self, w, b):
        self.w = w
        self.b = b


class ReLU:
    pass


class GSequential:
    """JAX/Pallas port of optimal_agents.policies.node_policy.GSequential.

    The layer sequence is executed as a single fused Pallas kernel; GCN layers consume
    the symmetric-normalized adjacency (derived from edge_index), other layers act on
    node features only — same dispatch semantics as the PyTorch module.
    """

    def __init__(self, *layers, graph_conv_class=None):
        self.layers = list(layers)
        self.graph_conv_class = graph_conv_class

    def forward(self, x, edge_index, batch=None, a_norm=None):
        # TODO(synk): `batch` (graph batching vector) is unused, as in the reference forward.
        if a_norm is None:
            # Plain-JAX glue; pass a precomputed a_norm to amortize over a static graph.
            a_norm = normalized_adjacency(edge_index, x.shape[0])
        return _fused_forward(self.layers, self.graph_conv_class, x, a_norm)

    __call__ = forward


def normalized_adjacency(edge_index, num_nodes):
    """D^-1/2 (A + I) D^-1/2 from edge_index [2, E] (src row 0, dst row 1)."""
    src, dst = edge_index[0], edge_index[1]
    a = jnp.zeros((num_nodes, num_nodes), jnp.float32).at[dst, src].set(1.0)
    a = a + jnp.eye(num_nodes, dtype=jnp.float32)  # self-loops
    deg = a.sum(axis=1)
    d_inv_sqrt = jnp.where(deg > 0, 1.0 / jnp.sqrt(deg), 0.0)
    return d_inv_sqrt[:, None] * a * d_inv_sqrt[None, :]


# ----------------------------- main / demo -----------------------------------

def _glorot(key, shape):
    fan_in, fan_out = shape
    limit = jnp.sqrt(6.0 / (fan_in + fan_out))
    return jax.random.uniform(key, shape, jnp.float32, -limit, limit)


def _reference_forward(x, a_norm, params):
    (w1, b1), (w2, b2), (w3, b3) = params
    h = a_norm @ x @ w1 + b1
    h = jnp.maximum(h, 0.0)
    h = a_norm @ h @ w2 + b2
    h = jnp.maximum(h, 0.0)
    return h @ w3 + b3


if __name__ == "__main__":
    key = jax.random.PRNGKey(0)
    k_x, k_w1, k_w2, k_w3 = jax.random.split(key, 4)

    N, F_IN, HIDDEN, F_OUT = 16, 4, 32, 8

    # Node features [N, F_IN]
    x = jax.random.normal(k_x, (N, F_IN), jnp.float32)

    # Deterministic bidirectional ring graph, edge_index [2, 2N]
    idx = jnp.arange(N)
    nxt = (idx + 1) % N
    edge_index = jnp.stack(
        [jnp.concatenate([idx, nxt]), jnp.concatenate([nxt, idx])], axis=0
    ).astype(jnp.int32)

    # Deterministic parameters
    w1, b1 = _glorot(k_w1, (F_IN, HIDDEN)), jnp.zeros((HIDDEN,), jnp.float32)
    w2, b2 = _glorot(k_w2, (HIDDEN, HIDDEN)), jnp.zeros((HIDDEN,), jnp.float32)
    w3, b3 = _glorot(k_w3, (HIDDEN, F_OUT)), jnp.zeros((F_OUT,), jnp.float32)

    model = GSequential(
        GCNConv(w1, b1),
        ReLU(),
        GCNConv(w2, b2),
        ReLU(),
        Linear(w3, b3),
        graph_conv_class=GCNConv,
    )

    # JIT the whole forward (adjacency glue + single fused pallas_call + output slice).
    fwd = jax.jit(lambda xx, ei: model(xx, ei))
    out = fwd(x, edge_index)
    jax.block_until_ready(out)

    assert out.shape == (N, F_OUT), out.shape

    # Numerical sanity check against a plain-JAX reference.
    a_norm = normalized_adjacency(edge_index, N)
    ref = _reference_forward(x, a_norm, [(w1, b1), (w2, b2), (w3, b3)])
    assert jnp.allclose(out, ref, atol=1e-2, rtol=1e-2), float(jnp.max(jnp.abs(out - ref)))

    print("KERNEL_OK")
</pallas_src>

<mosaic_0001>
module attributes {stable_mosaic.version = 11 : i64} {
  func.func @kernel(%arg0: memref<16x16xf32, #tpu.memory_space<vmem>>, %arg1: memref<16x4xf32, #tpu.memory_space<vmem>>, %arg2: memref<4x32xf32, #tpu.memory_space<vmem>>, %arg3: memref<1x32xf32, #tpu.memory_space<vmem>>, %arg4: memref<32x32xf32, #tpu.memory_space<vmem>>, %arg5: memref<1x32xf32, #tpu.memory_space<vmem>>, %arg6: memref<32x128xf32, #tpu.memory_space<vmem>>, %arg7: memref<1x128xf32, #tpu.memory_space<vmem>>, %arg8: memref<16x128xf32, #tpu.memory_space<vmem>>) attributes {dimension_semantics = [], scalar_prefetch = 0 : i64, scratch_operands = 0 : i64, tpu.core_type = #tpu.core_type<tc>} {
    %c0 = arith.constant 0 : index
    %c0_0 = arith.constant 0 : index
    %0 = vector.load %arg0[%c0, %c0_0] : memref<16x16xf32, #tpu.memory_space<vmem>>, vector<16x16xf32>
    %c0_1 = arith.constant 0 : index
    %c0_2 = arith.constant 0 : index
    %1 = vector.load %arg1[%c0_1, %c0_2] : memref<16x4xf32, #tpu.memory_space<vmem>>, vector<16x4xf32>
    %c0_3 = arith.constant 0 : index
    %c0_4 = arith.constant 0 : index
    %2 = vector.load %arg2[%c0_3, %c0_4] : memref<4x32xf32, #tpu.memory_space<vmem>>, vector<4x32xf32>
    %c0_5 = arith.constant 0 : index
    %c0_6 = arith.constant 0 : index
    %3 = vector.load %arg3[%c0_5, %c0_6] : memref<1x32xf32, #tpu.memory_space<vmem>>, vector<1x32xf32>
    %cst = arith.constant dense<0.000000e+00> : vector<16x4xf32>
    %4 = tpu.matmul %0, %1, %cst {dimension_numbers = #tpu.dot_dimension_numbers<[1], [0], [0], [1], [0, 0, 1, 1], [], []>} : vector<16x16xf32>, vector<16x4xf32>, vector<16x4xf32> -> vector<16x4xf32>
    %cst_7 = arith.constant dense<0.000000e+00> : vector<16x32xf32>
    %5 = tpu.matmul %4, %2, %cst_7 {dimension_numbers = #tpu.dot_dimension_numbers<[1], [0], [0], [1], [0, 0, 1, 1], [], []>} : vector<16x4xf32>, vector<4x32xf32>, vector<16x32xf32> -> vector<16x32xf32>
    %6 = vector.broadcast %3 : vector<1x32xf32> to vector<16x32xf32>
    %7 = arith.addf %5, %6 : vector<16x32xf32>
    %cst_8 = arith.constant 0.000000e+00 : f32
    %8 = vector.broadcast %cst_8 : f32 to vector<16x32xf32>
    %9 = arith.maximumf %7, %8 : vector<16x32xf32>
    %c0_9 = arith.constant 0 : index
    %c0_10 = arith.constant 0 : index
    %10 = vector.load %arg4[%c0_9, %c0_10] : memref<32x32xf32, #tpu.memory_space<vmem>>, vector<32x32xf32>
    %c0_11 = arith.constant 0 : index
    %c0_12 = arith.constant 0 : index
    %11 = vector.load %arg5[%c0_11, %c0_12] : memref<1x32xf32, #tpu.memory_space<vmem>>, vector<1x32xf32>
    %cst_13 = arith.constant dense<0.000000e+00> : vector<16x32xf32>
    %12 = tpu.matmul %0, %9, %cst_13 {dimension_numbers = #tpu.dot_dimension_numbers<[1], [0], [0], [1], [0, 0, 1, 1], [], []>} : vector<16x16xf32>, vector<16x32xf32>, vector<16x32xf32> -> vector<16x32xf32>
    %cst_14 = arith.constant dense<0.000000e+00> : vector<16x32xf32>
    %13 = tpu.matmul %12, %10, %cst_14 {dimension_numbers = #tpu.dot_dimension_numbers<[1], [0], [0], [1], [0, 0, 1, 1], [], []>} : vector<16x32xf32>, vector<32x32xf32>, vector<16x32xf32> -> vector<16x32xf32>
    %14 = vector.broadcast %11 : vector<1x32xf32> to vector<16x32xf32>
    %15 = arith.addf %13, %14 : vector<16x32xf32>
    %cst_15 = arith.constant 0.000000e+00 : f32
    %16 = vector.broadcast %cst_15 : f32 to vector<16x32xf32>
    %17 = arith.maximumf %15, %16 : vector<16x32xf32>
    %c0_16 = arith.constant 0 : index
    %c0_17 = arith.constant 0 : index
    %18 = vector.load %arg6[%c0_16, %c0_17] : memref<32x128xf32, #tpu.memory_space<vmem>>, vector<32x128xf32>
    %c0_18 = arith.constant 0 : index
    %c0_19 = arith.constant 0 : index
    %19 = vector.load %arg7[%c0_18, %c0_19] : memref<1x128xf32, #tpu.memory_space<vmem>>, vector<1x128xf32>
    %cst_20 = arith.constant dense<0.000000e+00> : vector<16x128xf32>
    %20 = tpu.matmul %17, %18, %cst_20 {dimension_numbers = #tpu.dot_dimension_numbers<[1], [0], [0], [1], [0, 0, 1, 1], [], []>} : vector<16x32xf32>, vector<32x128xf32>, vector<16x128xf32> -> vector<16x128xf32>
    %21 = vector.broadcast %19 : vector<1x128xf32> to vector<16x128xf32>
    %22 = arith.addf %20, %21 : vector<16x128xf32>
    %c0_21 = arith.constant 0 : index
    %c0_22 = arith.constant 0 : index
    %23 = vector.load %arg8[%c0_21, %c0_22] : memref<16x128xf32, #tpu.memory_space<vmem>>, vector<16x128xf32>
    tpu.vector_store %arg8[%c0_21, %c0_22], %22 {strides = array<i32>} : memref<16x128xf32, #tpu.memory_space<vmem>>, vector<16x128xf32>,
    return
  }
}

</mosaic_0001>

<bundles_post_ra>
// kernel: _lambda_.1
= control target key start
LH: loop header
LB: loop body
LE: loop exit
PB: predicated region body
PF: predicated region fallthrough
CT: control target
= control target key end

     0   :  { %vm35_vm0 = vcmask 130048   ;;  %vm130_vm1 = vcmask 1043456   ;;  %vm123_vm2 = vcmask 31744   ;;  %vm297_vm3 = vcmask 261120   ;;  %s664_s1 = inlined_call_operand.vmem [shape: f32[16,4], index: 1, kind: input, shape index: {}]   ;;  %s665_s0 = inlined_call_operand.vmem [shape: f32[16,16], index: 0, kind: input, shape index: {}]   ;;  %s666_s2 = inlined_call_operand.vmem [shape: f32[4,32], index: 2, kind: input, shape index: {}]   ;;  %s667_s4 = inlined_call_operand.vmem [shape: f32[32,32], index: 4, kind: input, shape index: {}]   ;;  %s668_s3 = inlined_call_operand.vmem [shape: f32[1,32], index: 3, kind: input, shape index: {}, may-alias: {3,5}]   ;;  %s669_s6 = inlined_call_operand.vmem [shape: f32[32,128], index: 6, kind: input, shape index: {}]   ;;  %s670_s5 = inlined_call_operand.vmem [shape: f32[1,32], index: 5, kind: input, shape index: {}, may-alias: {3,5}]   ;;  %s671_s7 = inlined_call_operand.vmem [shape: f32[1,128], index: 7, kind: input, shape index: {}]   ;;  %s672_s8 = inlined_call_operand.vmem [shape: f32[16,128], index: 8, kind: output, shape index: {}]  }
   0x1   :  { %v32_v0 = vld [vmem:[%s664_s1 + $0x8] sm:$0xff]  ;;  %v31_v1 = vld [vmem:[%s664_s1] sm:$0xff]  ;;  %v214_v7 = vld [vmem:[%s667_s4 + $0x18] sm:$0xff] }
   0x2   :  { %v29_v2 = vld [vmem:[%s665_s0] sm:$0xff]  ;;  %516 = vmatprep.subr.mxu0 %v32_v0  ;;  %v30_v3 = vld [vmem:[%s665_s0 + $0x8] sm:$0xff]  ;;  %v213_v8 = vld [vmem:[%s667_s4 + $0x10] sm:$0xff] }
   0x3   :  { %520 = vmatprep.mubr.msk.f32.mxu0 %vm35_vm0, %v29_v2  ;;  %517 = vmatpush3.msra.mxu0 %v32_v0  ;;  %v33_v4 = vld [vmem:[%s666_s2] sm:$0xf]  ;;  %v212_v16 = vld [vmem:[%s667_s4 + $0x8] sm:$0xff]  ;;  %v384_v20 = vld [vmem:[%s669_s6 + $0x18] sm:$0xff] }
   0x4   :  { %518 = vmatprep.subr.mxu0 %v31_v1  ;;  %523 = vmatprep.subr.msk.mxu1 %vm130_vm1, %v33_v4  ;;  %v481_v9 = vld [vmem:[%s668_s3] ss:$0 sm:$0xff]  ;;  %v383_v21 = vld [vmem:[%s669_s6 + $0x10] sm:$0xff]  ;;  %v382_v22 = vld [vmem:[%s669_s6 + $0x8] sm:$0xff] }
   0x5   :  { %519 = vmatpush3.msra.mxu0 %v31_v1  ;;  %524 = vmatpush3.msk.msra.mxu1 %vm130_vm1, %v33_v4  ;;  %v211_v17 = vld [vmem:[%s667_s4] sm:$0xff] }
   0x6   :  { %521 = vmatmul.mubr.msk.f32.vlgmr.msra.gmra.mxu0 %vm35_vm0, %v30_v3  ;;  %535 = vmatprep.subr.mxu0 %v214_v7  ;;  %v381_v23 = vld [vmem:[%s669_s6] sm:$0xff] }
   0x7   :  { %536 = vmatpush3.msra.mxu0 %v214_v7  ;;  %v487_v24 = vld [vmem:[%s670_s5] ss:$0 sm:$0xff] }
   0x8   :  { %537 = vmatprep.subr.mxu0 %v213_v8  ;;  %v490_v31 = vld [vmem:[%s671_s7] ss:$0 sm:$0xff] }
   0x9   :  { %538 = vmatpush3.msra.mxu0 %v213_v8 }
   0xa   :  { %539 = vmatprep.subr.mxu0 %v212_v16 }
   0xb   :  { %540 = vmatpush3.msra.mxu0 %v212_v16 }
   0xc   :  { %541 = vmatprep.subr.mxu0 %v211_v17 }
   0xd   :  { %542 = vmatpush3.msra.mxu0 %v211_v17 }
  0xc6   :  { %v522_v5 = vpop.f32.mrf.mxu0 }
  0xc8   :  { %v108_v6 = vpop.f32.mrf.mxu0 }
  0xc9   :  { %525 = vmatprep.mubr.msk.f32.mxu1 %vm123_vm2, %v108_v6 }
  0xca   :  { %526 = vmatmul.mubr.msk.f32.vlgmr.msra.gmra.mxu1 %vm123_vm2, %v522_v5 }
  0xcb   :  { %532 = vmatprep.mubr.msk.f32.mxu1 %vm35_vm0, %v29_v2 }
 0x18a   :  { %v527_v10 = vpop.f32.mrf.mxu1 }
 0x18b   :  { %v206_v11 = vadd.f32 %v527_v10, %v481_v9 }
 0x18c   :  { %v200_v12 = vpop.f32.mrf.mxu1 }
 0x18d   :  { %v210_v13 = vmax.f32 %v206_v11, 0.0  ;;  %v201_v14 = vadd.f32 %v481_v9, %v200_v12 }
 0x18f   :  { %v209_v15 = vmax.f32 %v201_v14, 0.0  ;;  %528 = vmatprep.subr.mxu1 %v210_v13 }
 0x190   :  { %529 = vmatpush3.msra.mxu1 %v210_v13 }
 0x191   :  { %530 = vmatprep.subr.mxu1 %v209_v15 }
 0x192   :  { %531 = vmatpush3.msra.mxu1 %v209_v15 }
 0x193   :  { %533 = vmatmul.mubr.msk.f32.vlgmr.msra.gmra.mxu1 %vm35_vm0, %v30_v3  ;;  %546 = vmatprep.subr.mxu1 %v384_v20 }
 0x194   :  { %547 = vmatpush3.msra.mxu1 %v384_v20 }
 0x195   :  { %548 = vmatprep.subr.mxu1 %v383_v21 }
 0x196   :  { %549 = vmatpush3.msra.mxu1 %v383_v21 }
 0x197   :  { %550 = vmatprep.subr.mxu1 %v382_v22 }
 0x198   :  { %551 = vmatpush3.msra.mxu1 %v382_v22 }
 0x199   :  { %552 = vmatprep.subr.mxu1 %v381_v23 }
 0x19a   :  { %553 = vmatpush3.msra.mxu1 %v381_v23 }
 0x253   :  { %v534_v18 = vpop.f32.mrf.mxu1 }
 0x255   :  { %v282_v19 = vpop.f32.mrf.mxu1 }
 0x256   :  { %543 = vmatprep.mubr.msk.f32.mxu0 %vm297_vm3, %v282_v19 }
 0x257   :  { %544 = vmatmul.mubr.msk.f32.vlgmr.msra.gmra.mxu0 %vm297_vm3, %v534_v18 }
 0x317   :  { %v545_v25 = vpop.f32.mrf.mxu0 }
 0x318   :  { %v376_v26 = vadd.f32 %v545_v25, %v487_v24 }
 0x319   :  { %v370_v27 = vpop.f32.mrf.mxu0 }
 0x31a   :  { %v371_v28 = vadd.f32 %v487_v24, %v370_v27  ;;  %v380_v30 = vmax.f32 %v376_v26, 0.0 }
 0x31c   :  { %v379_v29 = vmax.f32 %v371_v28, 0.0 }
 0x31e   :  { %554 = vmatprep.mubr.msk.f32.mxu1 %vm297_vm3, %v379_v29 }
 0x31f   :  { %555 = vmatmul.mubr.msk.f32.vlgmr.msra.gmra.mxu1 %vm297_vm3, %v380_v30 }
 0x3df   :  { %v556_v32 = vpop.f32.mrf.mxu1 }
 0x3e0   :  { %v470_v33 = vadd.f32 %v556_v32, %v490_v31 }
 0x3e1   :  { %v464_v34 = vpop.f32.mrf.mxu1 }
 0x3e2   :  { %474 = vst [vmem:[%s672_s8 + $0x8] sm:$0xff] %v470_v33  ;;  %v465_v35 = vadd.f32 %v490_v31, %v464_v34 }
 0x3e4   :  { %473 = vst [vmem:[%s672_s8] sm:$0xff] %v465_v35 }

</bundles_post_ra>
